<compile_context>
chip_gen: v5e
topology: v5e:2x2
jax: 0.10.0
libtpu: 0.0.40
codegen_flags: <defaults>
</compile_context>

<pallas_src>
import functools

import jax
import jax.numpy as jnp
from jax.experimental import pallas as pl
from jax.experimental.pallas import tpu as pltpu

_IGNORE_INDEX = -100  # PyTorch nn.NLLLoss default


def _round_up(x, m):
    return ((x + m - 1) // m) * m


def _pack_factor(n_rows, n_classes):
    """Largest k <= 128//C that divides N, so (N, C) -> (N//k, k*C) is a free reshape."""
    if n_rows <= 0 or n_classes >= 128:
        return 1
    kmax = max(1, 128 // n_classes)
    for k in range(kmax, 0, -1):
        if n_rows % k == 0:
            return k
    return 1


def _nll_tile_kernel(logp_ref, tgt_ref, sum_ref, cnt_ref, sum_acc, cnt_acc, *,
                     n_packed_rows, tile_rows, tiles_per_part, n_classes, pack_k):
    p = pl.program_id(0)   # core-parallel part (v7x megacore; outer loop elsewhere)
    t = pl.program_id(1)   # sequential tile within the part
    T = tile_rows
    kc = pack_k * n_classes

    @pl.when(t == 0)
    def _():
        sum_acc[...] = jnp.zeros_like(sum_acc)
        cnt_acc[...] = jnp.zeros_like(cnt_acc)

    # Global (unclamped) tile id.  The index_map clamps the DMA source index, so
    # a duplicated/overhanging tile is fully masked below via `prow`.
    g = p * tiles_per_part + t

    tgt = tgt_ref[...].astype(jnp.int32)                                 # (T, k)

    # Mask padded rows of partial/duplicate tiles and ignore_index rows.  Since
    # pack_k divides N, every packed row is either fully real or fully padding.
    prow = g * T + jax.lax.broadcasted_iota(jnp.int32, (T, pack_k), 0)
    valid = (prow < n_packed_rows) & (tgt != _IGNORE_INDEX)              # (T, k)

    # Wanted packed column per sub-row; fold validity into the index (-1 never
    # matches the non-negative column iota, so invalid rows contribute nothing).
    jcol = jax.lax.broadcasted_iota(jnp.int32, (T, pack_k), 1) * n_classes
    w = jnp.where(valid, tgt + jcol, -1).astype(jnp.float32)             # (T, k)

    # Broadcast each sub-row's wanted column across its C-lane group with a tiny
    # MXU matmul against a constant 0/1 expansion matrix E[j, q] = (q in group j).
    q = jax.lax.broadcasted_iota(jnp.int32, (pack_k, kc), 1)
    jlo = jax.lax.broadcasted_iota(jnp.int32, (pack_k, kc), 0) * n_classes
    expand = ((q >= jlo) & (q < jlo + n_classes)).astype(jnp.float32)    # (k, k*C)
    wanted = jnp.dot(w, expand, preferred_element_type=jnp.float32)      # (T, k*C)
    wanted = wanted.astype(jnp.int32)                                    # exact small ints

    col = jax.lax.broadcasted_iota(jnp.int32, (T, kc), 1)
    hit = col == wanted                                                  # (T, k*C)

    # Select in the native input dtype; accumulate rows into a lane-wide f32
    # partial (the cross-lane reduce happens once in the epilogue).
    picked = jnp.where(hit, logp_ref[...], jnp.zeros((), logp_ref.dtype))
    sum_acc[...] += jnp.sum(picked, axis=0, dtype=jnp.float32, keepdims=True)
    cnt_acc[...] += jnp.sum(valid, dtype=jnp.int32, keepdims=True)

    @pl.when(t == tiles_per_part - 1)
    def _():
        sum_ref[0] = jnp.sum(sum_acc[...], keepdims=True)
        cnt_ref[0] = cnt_acc[...]


def categorical_cross_entropy(output, target, *,
                              target_block_bytes=2 * 1024 * 1024,
                              tile_rows=None):
    """nn.NLLLoss() (mean, ignore_index=-100) on log-probs `output`, int `target`."""
    c = output.shape[-1]
    n = output.size // c

    k = _pack_factor(n, c)
    r = n // k                       # packed rows
    kc = k * c                       # packed lane width (<= 128 when C < 128)
    dsize = output.dtype.itemsize

    # Free, copy-less reshapes (row-major contiguous dim merges/splits).
    logp = output.reshape(r, kc)
    tgt = target.reshape(r, k).astype(jnp.int32)

    # --- byte-targeted tile sizing, clamped by a conservative VMEM budget -----
    row_payload = kc * dsize + k * 4                                  # HBM bytes / packed row
    row_vmem = _round_up(kc, 128) * dsize + _round_up(k, 128) * 4     # lane-padded VMEM bytes
    block_vmem_budget = 16 * 1024 * 1024                              # both double-buffered inputs

    if tile_rows is not None:
        t_rows = int(tile_rows)
    else:
        t_rows = max(1, target_block_bytes // row_payload)
        t_rows = min(t_rows, max(1, block_vmem_budget // (2 * row_vmem)))
    if t_rows >= r:
        t_rows = r                                   # single full block per part
    else:
        t_rows = min(max(16, (t_rows // 16) * 16), r)  # sublane-aligned (f32 & bf16)

    num_tiles = pl.cdiv(r, t_rows)
    num_parts = 2 if num_tiles >= 2 else 1           # v7x megacore split; harmless elsewhere
    tiles_per_part = pl.cdiv(num_tiles, num_parts)

    # VMEM limit: actual double-buffered block bytes + headroom for in-kernel
    # temporaries and Mosaic scratch, capped at 48 MiB (v7x has 64 MiB per TC).
    blocks_vmem = 2 * t_rows * row_vmem
    vmem_limit = int(min(48 * 1024 * 1024,
                         max(24 * 1024 * 1024, blocks_vmem + 20 * 1024 * 1024)))

    kernel = functools.partial(
        _nll_tile_kernel,
        n_packed_rows=r, tile_rows=t_rows, tiles_per_part=tiles_per_part,
        n_classes=c, pack_k=k)

    def block_idx(p, t):
        # Clamp so the final (possibly duplicated) tile of the last part never
        # DMAs out of range; its rows are masked in-kernel via `prow`.
        return (jnp.minimum(p * tiles_per_part + t, num_tiles - 1), 0)

    sums, cnts = pl.pallas_call(
        kernel,
        out_shape=(jax.ShapeDtypeStruct((num_parts, 1, 1), jnp.float32),
                   jax.ShapeDtypeStruct((num_parts, 1, 1), jnp.int32)),
        grid_spec=pltpu.PrefetchScalarGridSpec(
            num_scalar_prefetch=0,
            grid=(num_parts, tiles_per_part),
            in_specs=[
                pl.BlockSpec((t_rows, kc), block_idx),
                pl.BlockSpec((t_rows, k), block_idx),
            ],
            out_specs=[
                pl.BlockSpec((1, 1, 1), lambda p, t: (p, 0, 0)),
                pl.BlockSpec((1, 1, 1), lambda p, t: (p, 0, 0)),
            ],
            scratch_shapes=[
                pltpu.VMEM((1, kc), jnp.float32),   # lane-wide running sum of picked log-probs
                pltpu.VMEM((1, 1), jnp.int32),      # running count of non-ignored rows
            ],
        ),
        compiler_params=pltpu.CompilerParams(
            dimension_semantics=("parallel", "arbitrary"),
            vmem_limit_bytes=vmem_limit,
        ),
    )(logp, tgt)

    total = jnp.sum(sums)
    count = jnp.sum(cnts).astype(jnp.float32)
    return -(total / count)


if __name__ == "__main__":
    key = jax.random.PRNGKey(0)

    def reference(logp, tgt):
        c = logp.shape[-1]
        lp = logp.reshape(-1, c).astype(jnp.float32)
        tg = tgt.reshape(-1)
        valid = tg != _IGNORE_INDEX
        picked = lp[jnp.arange(lp.shape[0]), jnp.clip(tg, 0, c - 1)]
        return -(jnp.sum(jnp.where(valid, picked, 0.0))
                 / jnp.sum(valid).astype(jnp.float32))

    # Case 1: 10-class loss, f32, default byte-targeted tiling
    # (N=520 -> pack factor k=10, single packed block, grid (1,1)).
    k1, k2 = jax.random.split(key)
    B, S, C = 4, 130, 10
    logits = jax.random.normal(k1, (B, S, C), dtype=jnp.float32)
    log_probs = jax.nn.log_softmax(logits, axis=-1)
    target = jax.random.randint(k2, (B, S), 0, C, dtype=jnp.int32)
    target = target.at[0, 0].set(_IGNORE_INDEX).at[2, 5].set(_IGNORE_INDEX)

    out1 = jax.block_until_ready(categorical_cross_entropy(log_probs, target))
    ref1 = reference(log_probs, target)
    assert jnp.allclose(out1, ref1, atol=1e-5, rtol=1e-5), (out1, ref1)

    # Case 2: same data, forced tiny tiles -> multi-tile grid, two-part parallel
    # axis, masked partial final tile.
    out2 = jax.block_until_ready(
        categorical_cross_entropy(log_probs, target, tile_rows=16))
    assert jnp.allclose(out2, ref1, atol=1e-5, rtol=1e-5), (out2, ref1)

    # Case 3: prime row count (no lane packing, k=1), bf16 log-probs, odd tile
    # count so one part also processes a fully-masked duplicate tile.
    k3, k4 = jax.random.split(k1)
    N3, C3 = 127, 10
    logits3 = jax.random.normal(k3, (N3, C3), dtype=jnp.float32)
    log_probs3 = jax.nn.log_softmax(logits3, axis=-1).astype(jnp.bfloat16)
    target3 = jax.random.randint(k4, (N3,), 0, C3, dtype=jnp.int32)
    target3 = target3.at[7].set(_IGNORE_INDEX)
    out3 = jax.block_until_ready(
        categorical_cross_entropy(log_probs3, target3, tile_rows=48))
    ref3 = reference(log_probs3, target3)
    assert jnp.allclose(out3, ref3, atol=1e-4, rtol=1e-4), (out3, ref3)

    print("KERNEL_OK")
</pallas_src>

<mosaic_0001>
module attributes {stable_mosaic.version = 11 : i64} {
  func.func @_nll_tile_kernel(%arg0: i32, %arg1: i32, %arg2: memref<52x100xf32, #tpu.memory_space<vmem>>, %arg3: memref<52x10xi32, #tpu.memory_space<vmem>>, %arg4: memref<1x1x1xf32, #tpu.memory_space<vmem>>, %arg5: memref<1x1x1xi32, #tpu.memory_space<vmem>>, %arg6: memref<1x100xf32, #tpu.memory_space<vmem>>, %arg7: memref<1x1xi32, #tpu.memory_space<vmem>>) attributes {dimension_semantics = [#tpu.dimension_semantics<parallel>, #tpu.dimension_semantics<arbitrary>], iteration_bounds = array<i64: 1, 1>, scalar_prefetch = 0 : i64, scratch_operands = 2 : i64, tpu.core_type = #tpu.core_type<tc>, window_params = [{transform_indices = @transform_0, window_bounds = array<i64: 52, 100>}, {transform_indices = @transform_1, window_bounds = array<i64: 52, 10>}, {transform_indices = @transform_2, window_bounds = array<i64: 1, 1, 1>}, {transform_indices = @transform_3, window_bounds = array<i64: 1, 1, 1>}]} {
    %c0_i32 = arith.constant 0 : i32
    %0 = arith.cmpi eq, %arg1, %c0_i32 : i32
    %1 = arith.extui %0 : i1 to i32
    %c0_i32_0 = arith.constant 0 : i32
    %2 = arith.cmpi ne, %1, %c0_i32_0 : i32
    scf.if %2 {
      %cst_20 = arith.constant 0.000000e+00 : f32
      %57 = vector.broadcast %cst_20 : f32 to vector<1x100xf32>
      %c0_21 = arith.constant 0 : index
      %c0_22 = arith.constant 0 : index
      %58 = vector.load %arg6[%c0_21, %c0_22] : memref<1x100xf32, #tpu.memory_space<vmem>>, vector<1x100xf32>
      tpu.vector_store %arg6[%c0_21, %c0_22], %57 {strides = array<i32>} : memref<1x100xf32, #tpu.memory_space<vmem>>, vector<1x100xf32>,
      %c0_i32_23 = arith.constant 0 : i32
      %59 = vector.broadcast %c0_i32_23 : i32 to vector<1x1xi32>
      %c0_24 = arith.constant 0 : index
      %c0_25 = arith.constant 0 : index
      %60 = vector.load %arg7[%c0_24, %c0_25] : memref<1x1xi32, #tpu.memory_space<vmem>>, vector<1x1xi32>
      tpu.vector_store %arg7[%c0_24, %c0_25], %59 {strides = array<i32>} : memref<1x1xi32, #tpu.memory_space<vmem>>, vector<1x1xi32>,
    } else {
    }
    %c1_i32 = arith.constant 1 : i32
    %3 = arith.muli %arg0, %c1_i32 : i32
    %4 = arith.addi %3, %arg1 : i32
    %c0 = arith.constant 0 : index
    %c0_1 = arith.constant 0 : index
    %5 = vector.load %arg3[%c0, %c0_1] : memref<52x10xi32, #tpu.memory_space<vmem>>, vector<52x10xi32>
    %c52_i32 = arith.constant 52 : i32
    %6 = arith.muli %4, %c52_i32 : i32
    %7 = tpu.iota {dimensions = array<i32: 0>} : vector<52x10xi32>
    %8 = vector.broadcast %6 : i32 to vector<52x10xi32>
    %9 = arith.addi %8, %7 : vector<52x10xi32>
    %c52_i32_2 = arith.constant 52 : i32
    %10 = vector.broadcast %c52_i32_2 : i32 to vector<52x10xi32>
    %11 = arith.cmpi slt, %9, %10 : vector<52x10xi32>
    %c-100_i32 = arith.constant -100 : i32
    %12 = vector.broadcast %c-100_i32 : i32 to vector<52x10xi32>
    %13 = arith.cmpi ne, %5, %12 : vector<52x10xi32>
    %14 = arith.andi %11, %13 : vector<52x10xi1>
    %15 = tpu.iota {dimensions = array<i32: 1>} : vector<52x10xi32>
    %c10_i32 = arith.constant 10 : i32
    %16 = vector.broadcast %c10_i32 : i32 to vector<52x10xi32>
    %17 = arith.muli %15, %16 : vector<52x10xi32>
    %18 = arith.addi %5, %17 : vector<52x10xi32>
    %c-1_i32 = arith.constant -1 : i32
    %19 = vector.broadcast %c-1_i32 : i32 to vector<52x10xi32>
    %20 = arith.select %14, %18, %19 : vector<52x10xi1>, vector<52x10xi32>
    %21 = arith.sitofp %20 : vector<52x10xi32> to vector<52x10xf32>
    %22 = tpu.iota {dimensions = array<i32: 1>} : vector<10x100xi32>
    %23 = tpu.iota {dimensions = array<i32: 0>} : vector<10x100xi32>
    %c10_i32_3 = arith.constant 10 : i32
    %24 = vector.broadcast %c10_i32_3 : i32 to vector<10x100xi32>
    %25 = arith.muli %23, %24 : vector<10x100xi32>
    %26 = arith.cmpi sge, %22, %25 : vector<10x100xi32>
    %c10_i32_4 = arith.constant 10 : i32
    %27 = vector.broadcast %c10_i32_4 : i32 to vector<10x100xi32>
    %28 = arith.addi %25, %27 : vector<10x100xi32>
    %29 = arith.cmpi slt, %22, %28 : vector<10x100xi32>
    %30 = arith.andi %26, %29 : vector<10x100xi1>
    %31 = arith.extui %30 : vector<10x100xi1> to vector<10x100xi32>
    %32 = arith.sitofp %31 : vector<10x100xi32> to vector<10x100xf32>
    %cst = arith.constant dense<0.000000e+00> : vector<52x100xf32>
    %33 = tpu.matmul %21, %32, %cst {dimension_numbers = #tpu.dot_dimension_numbers<[1], [0], [0], [1], [0, 0, 1, 1], [], []>} : vector<52x10xf32>, vector<10x100xf32>, vector<52x100xf32> -> vector<52x100xf32>
    %34 = arith.fptosi %33 : vector<52x100xf32> to vector<52x100xi32>
    %35 = tpu.iota {dimensions = array<i32: 1>} : vector<52x100xi32>
    %36 = arith.cmpi eq, %35, %34 : vector<52x100xi32>
    %c0_5 = arith.constant 0 : index
    %c0_6 = arith.constant 0 : index
    %37 = vector.load %arg2[%c0_5, %c0_6] : memref<52x100xf32, #tpu.memory_space<vmem>>, vector<52x100xf32>
    %cst_7 = arith.constant 0.000000e+00 : f32
    %38 = vector.broadcast %cst_7 : f32 to vector<52x100xf32>
    %39 = arith.select %36, %37, %38 : vector<52x100xi1>, vector<52x100xf32>
    %c0_8 = arith.constant 0 : index
    %c0_9 = arith.constant 0 : index
    %40 = vector.load %arg6[%c0_8, %c0_9] : memref<1x100xf32, #tpu.memory_space<vmem>>, vector<1x100xf32>
    %cst_10 = arith.constant dense<0.000000e+00> : vector<100xf32>
    %41 = vector.multi_reduction <add>, %39, %cst_10 [0] : vector<52x100xf32> to vector<100xf32>
    %42 = vector.shape_cast %41 : vector<100xf32> to vector<1x100xf32>
    %43 = arith.addf %40, %42 : vector<1x100xf32>
    %c0_11 = arith.constant 0 : index
    %c0_12 = arith.constant 0 : index
    %44 = vector.load %arg6[%c0_11, %c0_12] : memref<1x100xf32, #tpu.memory_space<vmem>>, vector<1x100xf32>
    tpu.vector_store %arg6[%c0_11, %c0_12], %43 {strides = array<i32>} : memref<1x100xf32, #tpu.memory_space<vmem>>, vector<1x100xf32>,
    %c0_13 = arith.constant 0 : index
    %c0_14 = arith.constant 0 : index
    %45 = vector.load %arg7[%c0_13, %c0_14] : memref<1x1xi32, #tpu.memory_space<vmem>>, vector<1x1xi32>
    %46 = arith.extui %14 : vector<52x10xi1> to vector<52x10xi32>
    %47 = vector.shape_cast %46 : vector<52x10xi32> to vector<1x52x10xi32>
    %cst_15 = arith.constant dense<0> : vector<1xi32>
    %48 = vector.multi_reduction <add>, %47, %cst_15 [1, 2] : vector<1x52x10xi32> to vector<1xi32>
    %49 = vector.shape_cast %48 : vector<1xi32> to vector<1x1x1xi32>
    %50 = vector.extract %49[0, 0, 0] : i32 from vector<1x1x1xi32>
    %51 = vector.broadcast %50 : i32 to vector<1x1xi32>
    %52 = arith.addi %45, %51 : vector<1x1xi32>
    %c0_16 = arith.constant 0 : index
    %c0_17 = arith.constant 0 : index
    %53 = vector.load %arg7[%c0_16, %c0_17] : memref<1x1xi32, #tpu.memory_space<vmem>>, vector<1x1xi32>
    tpu.vector_store %arg7[%c0_16, %c0_17], %52 {strides = array<i32>} : memref<1x1xi32, #tpu.memory_space<vmem>>, vector<1x1xi32>,
    %c0_i32_18 = arith.constant 0 : i32
    %54 = arith.cmpi eq, %arg1, %c0_i32_18 : i32
    %55 = arith.extui %54 : i1 to i32
    %c0_i32_19 = arith.constant 0 : i32
    %56 = arith.cmpi ne, %55, %c0_i32_19 : i32
    scf.if %56 {
      %c0_20 = arith.constant 0 : index
      %c0_21 = arith.constant 0 : index
      %57 = vector.load %arg6[%c0_20, %c0_21] : memref<1x100xf32, #tpu.memory_space<vmem>>, vector<1x100xf32>
      %58 = vector.shape_cast %57 : vector<1x100xf32> to vector<1x1x100xf32>
      %cst_22 = arith.constant dense<0.000000e+00> : vector<1xf32>
      %59 = vector.multi_reduction <add>, %58, %cst_22 [1, 2] : vector<1x1x100xf32> to vector<1xf32>
      %60 = vector.shape_cast %59 : vector<1xf32> to vector<1x1x1xf32>
      %61 = vector.extract %60[0, 0, 0] : f32 from vector<1x1x1xf32>
      %62 = vector.broadcast %61 : f32 to vector<1x1xf32>
      %c0_23 = arith.constant 0 : index
      %c0_24 = arith.constant 0 : index
      %c0_25 = arith.constant 0 : index
      %63 = vector.load %arg4[%c0_23, %c0_24, %c0_25] : memref<1x1x1xf32, #tpu.memory_space<vmem>>, vector<1x1x1xf32>
      %64 = vector.shape_cast %63 : vector<1x1x1xf32> to vector<1x1xf32>
      %65 = vector.shape_cast %62 : vector<1x1xf32> to vector<1x1x1xf32>
      tpu.vector_store %arg4[%c0_23, %c0_24, %c0_25], %65 {strides = array<i32>} : memref<1x1x1xf32, #tpu.memory_space<vmem>>, vector<1x1x1xf32>,
      %c0_26 = arith.constant 0 : index
      %c0_27 = arith.constant 0 : index
      %66 = vector.load %arg7[%c0_26, %c0_27] : memref<1x1xi32, #tpu.memory_space<vmem>>, vector<1x1xi32>
      %c0_28 = arith.constant 0 : index
      %c0_29 = arith.constant 0 : index
      %c0_30 = arith.constant 0 : index
      %67 = vector.load %arg5[%c0_28, %c0_29, %c0_30] : memref<1x1x1xi32, #tpu.memory_space<vmem>>, vector<1x1x1xi32>
      %68 = vector.shape_cast %67 : vector<1x1x1xi32> to vector<1x1xi32>
      %69 = vector.shape_cast %66 : vector<1x1xi32> to vector<1x1x1xi32>
      tpu.vector_store %arg5[%c0_28, %c0_29, %c0_30], %69 {strides = array<i32>} : memref<1x1x1xi32, #tpu.memory_space<vmem>>, vector<1x1x1xi32>,
    } else {
    }
    return
  }
  func.func @transform_0(%arg0: i32, %arg1: i32) -> (i32, i32) {
    %c1_i32 = arith.constant 1 : i32
    %0 = arith.muli %arg0, %c1_i32 : i32
    %1 = arith.addi %0, %arg1 : i32
    %c0_i32 = arith.constant 0 : i32
    %2 = arith.minsi %1, %c0_i32 : i32
    %c0_i32_0 = arith.constant 0 : i32
    %c0_i32_1 = arith.constant 0 : i32
    return %2, %c0_i32_0 : i32, i32
  }
  func.func @transform_1(%arg0: i32, %arg1: i32) -> (i32, i32) {
    %c1_i32 = arith.constant 1 : i32
    %0 = arith.muli %arg0, %c1_i32 : i32
    %1 = arith.addi %0, %arg1 : i32
    %c0_i32 = arith.constant 0 : i32
    %2 = arith.minsi %1, %c0_i32 : i32
    %c0_i32_0 = arith.constant 0 : i32
    %c0_i32_1 = arith.constant 0 : i32
    return %2, %c0_i32_0 : i32, i32
  }
  func.func @transform_2(%arg0: i32, %arg1: i32) -> (i32, i32, i32) {
    %c0_i32 = arith.constant 0 : i32
    %c0_i32_0 = arith.constant 0 : i32
    %c0_i32_1 = arith.constant 0 : i32
    return %arg0, %c0_i32, %c0_i32_0 : i32, i32, i32
  }
  func.func @transform_3(%arg0: i32, %arg1: i32) -> (i32, i32, i32) {
    %c0_i32 = arith.constant 0 : i32
    %c0_i32_0 = arith.constant 0 : i32
    %c0_i32_1 = arith.constant 0 : i32
    return %arg0, %c0_i32, %c0_i32_0 : i32, i32, i32
  }
}

</mosaic_0001>

<bundles_post_ra>
// kernel: tpu_custom_call.1
= control target key start
LH: loop header
LB: loop body
LE: loop exit
PB: predicated region body
PF: predicated region fallthrough
CT: control target
= control target key end

     0   :  { %9 = vsyncpa [#allocation5], 0  ;;  %v96_v0 = vlaneseq  ;;  %s711_s0 = inlined_call_operand.vmem [shape: f32[52,100], index: 0, kind: input, shape index: {}]   ;;  %s712_s1 = inlined_call_operand.vmem [shape: s32[52,10], index: 1, kind: input, shape index: {}]   ;;  %s713_s2 = inlined_call_operand.hbm [shape: f32[1,1,1], index: 2, kind: output, shape index: {0}]   ;;  %s714_s3 = inlined_call_operand.hbm [shape: s32[1,1,1], index: 3, kind: output, shape index: {1}]  }
   0x1   :  { %v538_v3 = vld [vmem:[%s712_s1] sm:$0xff]  ;;  %v543_v4 = vld [vmem:[%s712_s1 + $0x10] sm:$0xff]  ;;  %v549_v8 = vld [vmem:[%s712_s1 + $0x28] sm:$0xff] }
   0x2   :  { %v97_v1 = vshrl.u32 %v96_v0, 7  ;;  %v533_v2 = vand.u32 127, %v96_v0 }
   0x4   :  { %v98_v5 = vadd.s32 8, %v97_v1  ;;  %v157_v6 = vmul.u32 10, %v97_v1  ;;  %v135_v7 = vmul.u32 10, %v533_v2 }
   0x5   :  { %10 = vsyncpa [#allocation7], 0  ;;  %vm119_vm0 = vcmp.ne.s32.totalorder %v538_v3, 4294967196  ;;  %v555_v9 = vld [vmem:[%s712_s1 + $0x20] sm:$0xff]  ;;  %vm121_vm1 = vcmp.ne.s32.totalorder %v543_v4, 4294967196  ;;  %vm124_vm2 = vcmp.ne.s32.totalorder %v549_v8, 4294967196 }
   0x6   :  { %v158_v10 = vmul.u32 10, %v98_v5  ;;  %v161_v11 = vadd.s32 10, %v157_v6  ;;  %v136_v12 = vadd.s32 %v135_v7, %v538_v3  ;;  %v138_v13 = vadd.s32 %v135_v7, %v543_v4  ;;  %v94_v18 = vld [vmem:[%s712_s1 + $0x30] sm:$0xf]  ;;  %v89_v21 = vld [vmem:[%s712_s1 + $0x8] sm:$0xff]  ;;  %v91_v23 = vld [vmem:[%s712_s1 + $0x18] sm:$0xff] }
   0x7   :  { %v141_v14 = vadd.s32 %v135_v7, %v549_v8  ;;  %v140_v17 = vadd.s32 %v135_v7, %v555_v9  ;;  %vm159_vm4 = vcmp.ge.s32.totalorder %v533_v2, %v157_v6  ;;  %vm123_vm6 = vcmp.ne.s32.totalorder %v555_v9, 4294967196  ;;  %s511_s12 = smov [#allocation6]   ;;  %s369_s16 = sshll.u32 %s714_s3, 4  ;;  %s370_s16 = int_to_ptr.hbm [resolvable:$true] %s369_s16 }
   0x8   :  { %vm160_vm3 = vcmp.ge.s32.totalorder %v533_v2, %v158_v10  ;;  %v162_v15 = vadd.s32 10, %v158_v10  ;;  %v143_v16 = vsel %vm119_vm0, %v136_v12, 4294967295  ;;  %vm163_vm5 = vcmp.lt.s32.totalorder %v533_v2, %v161_v11  ;;  %s367_s13 = sshll.u32 %s511_s12, 4  ;;  %s512_s17 = smov [#allocation4]   ;;  %s368_s13 = int_to_ptr.vmem [resolvable:$true] %s367_s13 }
   0x9   :  { %vm193_vm8 = vcmask 1041408   ;;  %v145_v19 = vsel %vm121_vm1, %v138_v13, 4294967295  ;;  %v148_v20 = vsel %vm124_vm2, %v141_v14, 4294967295  ;;  %v150_v22 = vcvt.s32.f32 %v143_v16  ;;  %vm584_vm10 = vmand %vm159_vm4, %vm163_vm5  ;;  %s356_s18 = sshll.u32 %s512_s17, 4  ;;  %s358_s21 = sshll.u32 %s713_s2, 4  ;;  %s357_s18 = int_to_ptr.vmem [resolvable:$true] %s356_s18  ;;  %s359_s21 = int_to_ptr.hbm [resolvable:$true] %s358_s21 }
   0xa   :  { %vm164_vm7 = vcmp.lt.s32.totalorder %v533_v2, %v162_v15  ;;  %v508_v24 = vmov 0.0   ;;  %v147_v27 = vsel %vm123_vm6, %v140_v17, 4294967295  ;;  %v103_v28 = vadd.s32 48, %v97_v1 }
   0xb   :  { %vm166_vm9 = vmand %vm160_vm3, %vm164_vm7  ;;  %vm125_vm11 = vcmp.ne.s32.totalorder %v94_v18, 4294967196  ;;  %vm171_vm12 = vcmask 80896   ;;  %v152_v29 = vcvt.s32.f32 %v145_v19  ;;  %v155_v30 = vcvt.s32.f32 %v148_v20 }
   0xc   :  { %v396_v25 = vsel %vm166_vm9, 1.0, %v508_v24  ;;  %v137_v31 = vadd.s32 %v135_v7, %v89_v21  ;;  %vm120_vm13 = vcmp.ne.s32.totalorder %v89_v21, 4294967196  ;;  %v139_v32 = vadd.s32 %v135_v7, %v91_v23 }
   0xd   :  { %397 = vmatpush.msk.msra.mxu0 %vm193_vm8, %v396_v25  ;;  %406 = vmatpush.msk.msra.mxu1 %vm193_vm8, %v396_v25  ;;  %vm118_vm14 = vcmp.lt.s32.totalorder %v103_v28, 52  ;;  %v142_v33 = vadd.s32 %v135_v7, %v94_v18  ;;  %v509_v34 = vmov 1.0   ;;  %v154_v35 = vcvt.s32.f32 %v147_v27  ;;  %v251_v28 = vld [vmem:[%s711_s0 + $0x10] sm:$0xff] }
   0xe   :  { %408 = vmatpush.msk.msra.mxu3 %vm193_vm8, %v396_v25  ;;  %407 = vmatpush.msk.msra.mxu2 %vm193_vm8, %v396_v25  ;;  %vm122_vm15 = vcmp.ne.s32.totalorder %v91_v23, 4294967196  ;;  %vm599_vm3 = vmand %vm118_vm14, %vm125_vm11  ;;  %v144_v37 = vsel %vm120_vm13, %v137_v31, 4294967295  ;;  %v510_v43 = vmov 0   ;;  %vm264_vm11 = vcmask 818176  }
   0xf   :  { %398 = vmatpush.msk.msra.mxu0 %vm584_vm10, %v509_v34  ;;  %409 = vmatpush.msk.msra.mxu1 %vm584_vm10, %v509_v34  ;;  %v146_v38 = vsel %vm122_vm15, %v139_v32, 4294967295  ;;  %v149_v39 = vsel %vm599_vm3, %v142_v33, 4294967295  ;;  %v151_v40 = vcvt.s32.f32 %v144_v37  ;;  %v289_v44 = vsel %vm119_vm0, 1, %v510_v43  ;;  %v250_v33 = vld [vmem:[%s711_s0 + $0x8] sm:$0xff] }
  0x10   :  { %399 = vmatmul.msk.f32.vlgmr.msra.gmra.mxu0 %vm171_vm12, %v150_v22  ;;  %411 = vmatpush.msk.msra.mxu3 %vm584_vm10, %v509_v34  ;;  %v153_v41 = vcvt.s32.f32 %v146_v38  ;;  %v156_v42 = vcvt.s32.f32 %v149_v39  ;;  %v291_v45 = vsel %vm121_vm1, 1, %v510_v43  ;;  %v294_v46 = vsel %vm124_vm2, 1, %v510_v43  ;;  %v252_v39 = vld [vmem:[%s711_s0 + $0x18] sm:$0xff] }
  0x11   :  { %401 = vmatmul.msk.f32.vlgmr.msra.gmra.mxu1 %vm171_vm12, %v152_v29  ;;  %404 = vmatmul.msk.f32.vlgmr.msra.gmra.mxu3 %vm171_vm12, %v155_v30  ;;  %v293_v47 = vsel %vm123_vm6, 1, %v510_v43  ;;  %v290_v48 = vsel %vm120_vm13, 1, %v510_v43  ;;  %v295_v49 = vsel %vm599_vm3, 1, %v510_v43  ;;  %vm304_vm0 = vcmask 76800  }
  0x12   :  { %410 = vmatpush.msk.msra.mxu2 %vm584_vm10, %v509_v34  ;;  %v296_v50 = vsel %vm171_vm12, %v289_v44, 0  ;;  %v298_v51 = vsel %vm171_vm12, %v291_v45, 0  ;;  %v302_v52 = vsel %vm171_vm12, %v294_v46, 0  ;;  %v300_v53 = vsel %vm171_vm12, %v293_v47, 0  ;;  %v253_v44 = vld [vmem:[%s711_s0 + $0x20] sm:$0xff] }
  0x13   :  { %403 = vmatmul.msk.f32.vlgmr.msra.gmra.mxu2 %vm171_vm12, %v154_v35  ;;  %v297_v54 = vsel %vm171_vm12, %v290_v48, 0  ;;  %v305_v55 = vsel %vm304_vm0, %v295_v49, 0  ;;  %v292_v56 = vsel %vm122_vm15, 1, %v510_v43  ;;  %v301_v57 = vadd.s32 %v300_v53, %v296_v50 }
  0x14   :  { %v303_v58 = vadd.s32 %v302_v52, %v297_v54  ;;  %v306_v59 = vadd.s32 %v305_v55, %v298_v51  ;;  %v299_v60 = vsel %vm171_vm12, %v292_v56, 0  ;;  %vm83_vm1 = vcmask 811008   ;;  %v254_v54 = vld [vmem:[%s711_s0 + $0x28] sm:$0xff] }
  0x15   :  { %84 = vst.msk [vmem:[#allocation2] sm:$0x1] %vm83_vm1, %v508_v24  ;;  %v249_v24 = vld [vmem:[%s711_s0] sm:$0xff]  ;;  %vm276_vm0 = vcmask 814080  }
  0x16   :  { %v307_v61 = vadd.s32 %v303_v58, %v301_v57  ;;  %v308_v62 = vadd.s32 %v306_v59, %v299_v60 }
  0x18   :  { %400 = vmatmul.msk.f32.gmra.mxu0 %vm171_vm12, %v151_v40  ;;  %v309_v63 = vadd.s32 %v308_v62, %v307_v61 }
  0x19   :  { %402 = vmatmul.msk.f32.gmra.mxu1 %vm171_vm12, %v153_v41  ;;  %405 = vmatmul.msk.f32.gmra.mxu3 %vm171_vm12, %v156_v42 }
  0x1a   :  { %v311_v0 = vshrl.u32 %v309_v63, 16  ;;  %v310_v3 = vand.u32 65535, %v309_v63 }
  0x1c   :  { %v313_v1 = vcvt.s32.f32 %v311_v0  ;;  %v312_v4 = vcvt.s32.f32 %v310_v3  ;;  %v255_v0 = vld [vmem:[%s711_s0 + $0x30] sm:$0xf] }
  0x1e   :  { %316 = vadd.xlane.f32.xlu0 %v313_v1 }
  0x26   :  { %314 = vadd.xlane.f32.xlu0 %v312_v4 }
  0x8d   :  { %v214_v5 = vpop.f32.mrf.mxu0 }
  0x8e   :  { %vm412_vm2 = vcmp.lt.s32.totalorder %v214_v5, 0  ;;  %v413_v6 = vceil.f32 %v214_v5  ;;  %v414_v7 = vfloor.f32 %v214_v5  ;;  %v220_v8 = vpop.f32.mrf.mxu1 }
  0x8f   :  { %vm422_vm4 = vcmp.lt.s32.totalorder %v220_v8, 0  ;;  %v423_v9 = vceil.f32 %v220_v8  ;;  %v424_v10 = vfloor.f32 %v220_v8 }
  0x90   :  { %v415_v11 = vsel %vm412_vm2, %v413_v6, %v414_v7 }
  0x91   :  { %v416_v12 = vcvt.f32.s32 %v415_v11  ;;  %v425_v13 = vsel %vm422_vm4, %v423_v9, %v424_v10  ;;  %vm85_vm4 = vcmask 0  }
  0x92   :  { %v426_v14 = vcvt.f32.s32 %v425_v13  ;;  %v263_v13 = vld [vmem:[#allocation2] sm:$0x1]  ;;  %86 = vst.msk [vmem:[#allocation3] sm:$0x1] %vm85_vm4, %v510_v43 }
  0x93   :  { %vm646_vm5 = vcmp.eq.s32.totalorder %v533_v2, %v416_v12 }
  0x94   :  { %v229_v15 = vpop.f32.mrf.mxu3  ;;  %vm651_vm6 = vcmp.eq.s32.totalorder %v533_v2, %v426_v14  ;;  %v256_v36 = vsel %vm646_vm5, %v249_v24, 0.0 }
  0x95   :  { %v217_v18 = vpop.f32.mrf.mxu0  ;;  %v438_v19 = vceil.f32 %v229_v15  ;;  %vm437_vm8 = vcmp.lt.s32.totalorder %v229_v15, 0  ;;  %v439_v25 = vfloor.f32 %v229_v15  ;;  %v258_v41 = vsel %vm651_vm6, %v251_v28, 0.0 }
  0x96   :  { %vm417_vm7 = vcmp.lt.s32.totalorder %v217_v18, 0  ;;  %v418_v20 = vceil.f32 %v217_v18  ;;  %v419_v21 = vfloor.f32 %v217_v18  ;;  %v223_v22 = vpop.f32.mrf.mxu1  ;;  %v226_v23 = vpop.f32.mrf.mxu2  ;;  %v265_v47 = vsel %vm264_vm11, %v256_v36, 0.0 }
  0x97   :  { %vm427_vm9 = vcmp.lt.s32.totalorder %v223_v22, 0  ;;  %v428_v26 = vceil.f32 %v223_v22  ;;  %v429_v27 = vfloor.f32 %v223_v22  ;;  %vm432_vm10 = vcmp.lt.s32.totalorder %v226_v23, 0 }
  0x98   :  { %v420_v29 = vsel %vm417_vm7, %v418_v20, %v419_v21  ;;  %v433_v30 = vceil.f32 %v226_v23  ;;  %v434_v31 = vfloor.f32 %v226_v23  ;;  %v440_v34 = vsel %vm437_vm8, %v438_v19, %v439_v25 }
  0x99   :  { %v421_v32 = vcvt.f32.s32 %v420_v29  ;;  %v430_v35 = vsel %vm427_vm9, %v428_v26, %v429_v27  ;;  %v441_v37 = vcvt.f32.s32 %v440_v34  ;;  %v268_v50 = vsel %vm264_vm11, %v258_v41, 0.0  ;;  %v288_v34 = vld [vmem:[#allocation3] sm:$0x1] }
  0x9a   :  { %v431_v38 = vcvt.f32.s32 %v430_v35  ;;  %v435_v40 = vsel %vm432_vm10, %v433_v30, %v434_v31 }
  0x9b   :  { %vm243_vm12 = vcmp.eq.s32.totalorder %v533_v2, %v421_v32  ;;  %v436_v42 = vcvt.f32.s32 %v435_v40  ;;  %vm682_vm15 = vcmp.eq.s32.totalorder %v533_v2, %v441_v37 }
  0x9c   :  { %v257_v45 = vsel %vm243_vm12, %v250_v33, 0.0  ;;  %vm245_vm13 = vcmp.eq.s32.totalorder %v533_v2, %v431_v38  ;;  %v232_v46 = vpop.f32.mrf.mxu3  ;;  %v261_v61 = vsel %vm682_vm15, %v254_v54, 0.0 }
  0x9d   :  { %v266_v48 = vsel %vm264_vm11, %v257_v45, 0.0  ;;  %v259_v49 = vsel %vm245_vm13, %v252_v39, 0.0  ;;  %vm246_vm14 = vcmp.eq.s32.totalorder %v533_v2, %v436_v42  ;;  %vm442_vm3 = vcmp.lt.s32.totalorder %v232_v46, 0 }
  0x9e   :  { %v267_v51 = vadd.f32 %v266_v48, %v265_v47  ;;  %v260_v53 = vsel %vm246_vm14, %v253_v44, 0.0  ;;  %v270_v55 = vsel %vm264_vm11, %v259_v49, 0.0  ;;  %v443_v56 = vceil.f32 %v232_v46 }
  0x9f   :  { %v444_v57 = vfloor.f32 %v232_v46  ;;  %v272_v59 = vsel %vm264_vm11, %v260_v53, 0.0  ;;  %v274_v3 = vsel %vm264_vm11, %v261_v61, 0.0 }
  0xa0   :  { %v269_v58 = vadd.f32 %v268_v50, %v267_v51 }
  0xa1   :  { %v445_v60 = vsel %vm442_vm3, %v443_v56, %v444_v57 }
  0xa2   :  { %v271_v62 = vadd.f32 %v270_v55, %v269_v58  ;;  %v446_v63 = vcvt.f32.s32 %v445_v60 }
  0xa4   :  { %v273_v1 = vadd.f32 %v272_v59, %v271_v62  ;;  %vm248_vm2 = vcmp.eq.s32.totalorder %v533_v2, %v446_v63  ;;  %v317_v2 = vpop.xlane.xlu0 %316 }
  0xa5   :  { %v262_v4 = vsel %vm248_vm2, %v255_v0, 0.0  ;;  %v319_v18 = vcvt.f32.s32 %v317_v2 }
  0xa6   :  { %v275_v5 = vadd.f32 %v274_v3, %v273_v1  ;;  %v277_v6 = vsel %vm276_vm0, %v262_v4, 0.0 }
  0xa7   :  { %v320_v19 = vshll.u32 %v319_v18, 16 }
  0xa8   :  { %v278_v7 = vadd.f32 %v277_v6, %v275_v5 }
  0xaa   :  { %v279_v8 = vrot.slane %v278_v7, 4 }
  0xac   :  { %v280_v9 = vadd.f32 %v279_v8, %v278_v7  ;;  %v315_v20 = vpop.xlane.xlu0 %314 }
  0xad   :  { %v318_v21 = vcvt.f32.s32 %v315_v20 }
  0xae   :  { %v281_v10 = vrot.slane %v280_v9, 2 }
  0xaf   :  { %v321_v22 = vadd.s32 %v320_v19, %v318_v21 }
  0xb0   :  { %v282_v11 = vadd.f32 %v281_v10, %v280_v9 }
  0xb1   :  { %v322_v23 = vrot.slane %v321_v22, 4 }
  0xb2   :  { %v283_v12 = vrot.slane %v282_v11, 1 }
  0xb3   :  { %v323_v24 = vadd.s32 %v322_v23, %v321_v22 }
  0xb4   :  { %v284_v14 = vadd.f32 %v283_v12, %v282_v11 }
  0xb5   :  { %v324_v25 = vrot.slane %v323_v24, 2 }
  0xb6   :  { %v285_v15 = vadd.f32 %v284_v14, %v263_v13 }
  0xb7   :  { %v325_v26 = vadd.s32 %v324_v25, %v323_v24 }
  0xb8   :  { %287 = vst.msk [vmem:[#allocation2] sm:$0x1] %vm83_vm1, %v285_v15 }
  0xb9   :  { %v326_v27 = vrot.slane %v325_v26, 1 }
  0xbb   :  { %v327_v28 = vadd.s32 %v326_v27, %v325_v26 }
  0xbd   :  { %447 = vpush %v327_v28 }
  0xbf   :  { %v336_v16 = vld [vmem:[#allocation2] sm:$0x1] }
  0xc0   :  { %v337_v17 = vsel %vm83_vm1, %v336_v16, 0.0 }
  0xc1   :  { %338 = vadd.xlane.f32.xlu1 %v337_v17 }
  0xee   :  { %s448_s0 = spop %447 }
  0xef   :  { %v329_v36 = vstv %s448_s0 }
  0xf0   :  { %v330_v37 = vadd.s32 %v329_v36, %v288_v34 }
  0xf2   :  { %332 = vst.msk [vmem:[#allocation3] sm:$0x1] %vm85_vm4, %v330_v37 }
  0xf9   :  { %v349_v43 = vld [vmem:[#allocation3] sm:$0x1] }
  0xfa   :  { %350 = vst.msk [vmem:[#allocation6] sm:$0x1] %vm85_vm4, %v349_v43 }
  0xfb   :  { %372 = dma.vmem_to_hbm [thread:$0]  %s368_s13, 16, %s370_s16, [#allocation7]  }
 0x134   :  { %v339_v29 = vpop.xlane.xlu1 %338 }
 0x135   :  { %v340_v30 = vrot.slane %v339_v29, 4 }
 0x137   :  { %v341_v31 = vadd.f32 %v340_v30, %v339_v29 }
 0x139   :  { %v342_v32 = vrot.slane %v341_v31, 2 }
 0x13b   :  { %v343_v33 = vadd.f32 %v342_v32, %v341_v31 }
 0x13d   :  { %v344_v35 = vrot.slane %v343_v33, 1 }
 0x13f   :  { %v345_v38 = vadd.f32 %v344_v35, %v343_v33 }
 0x141   :  { %449 = vpush %v345_v38 }
 0x172   :  { %s450_s22 = spop %449 }
 0x173   :  { %v347_v39 = vstv %s450_s22 }
 0x174   :  { %348 = vst.msk [vmem:[#allocation4] sm:$0x1] %vm85_vm4, %v347_v39 }
 0x175   :  { %361 = dma.vmem_to_hbm [thread:$0]  %s357_s18, 16, %s359_s21, [#allocation5]  }
 0x176   :  { %504 = dma.done.wait [#allocation5], 16  }
 0x177   :  { %505 = vsyncadd [#allocation5], 4294967280 }
 0x178   :  { %506 = dma.done.wait [#allocation7], 16  }
 0x179   :  { %507 = vsyncadd [#allocation7], 4294967280 }
 0x17a   :  { %381 = vsyncpa [#allocation5], 1 }
 0x17b   :  { %382 = vsyncpa [#allocation7], 1 }

</bundles_post_ra>
